<compile_context>
chip_gen: v7x
topology: tpu7x:2x2x1
jax: 0.10.0
libtpu: 0.0.40
codegen_flags: <defaults>
</compile_context>

<pallas_src>
import jax
import jax.numpy as jnp
from jax.experimental import pallas as pl
from jax.experimental.pallas import tpu as pltpu


def _round_up(v: int, m: int) -> int:
    return ((v + m - 1) // m) * m


def _vmem_capacity_bytes() -> int:
    """Physical VMEM of the local TensorCore; conservative default if unknown."""
    try:
        return int(pltpu.get_tpu_info().vmem_capacity_bytes)
    except Exception:
        return 64 * 1024 * 1024  # v7x per-TC VMEM (smallest across v5e/v6e/v7x)


def mlp_kernel(x_ref, w1_ref, b1_ref, w2_ref, b2_ref, y_ref):
    """One batch tile of y = relu(x @ W1 + b1) @ W2 + b2.

    x_ref : (TM, D_in)   f32   -> cast to bf16 in-register (no extra HBM pass)
    w1_ref: (D_in, Hp)   bf16     b1_ref: (1, Hp)     f32
    w2_ref: (Hp, D_out)  bf16     b2_ref: (1, D_out)  f32
    y_ref : (TM, D_out)  f32
    """
    x = x_ref[...].astype(w1_ref.dtype)                 # VPU cast, MXU eats bf16
    h = jnp.dot(x, w1_ref[...], preferred_element_type=jnp.float32)
    h = jnp.maximum(h + b1_ref[...], 0.0)               # bias + ReLU on f32 acc
    y = jnp.dot(h.astype(w2_ref.dtype), w2_ref[...],
                preferred_element_type=jnp.float32)
    y_ref[...] = (y + b2_ref[...]).astype(y_ref.dtype)


def prepare_params(w1, b1, w2, b2):
    """One-time weight conversion (call at init, NOT per forward step).

    Casts weights to bf16 for the MXU and zero-pads the hidden dim to a lane
    multiple only when needed (amortized cost; padded hidden columns/rows are
    zero so they contribute nothing).  Biases stay f32.
    """
    d_in, hidden = w1.shape
    d_out = w2.shape[1]
    hid_p = _round_up(hidden, 128)
    bf16, f32 = jnp.bfloat16, jnp.float32
    b1f = jnp.asarray(b1, f32).reshape(1, hidden)
    b2f = jnp.asarray(b2, f32).reshape(1, d_out)
    if hid_p == hidden:
        return w1.astype(bf16), b1f, w2.astype(bf16), b2f
    w1p = jnp.zeros((d_in, hid_p), bf16).at[:, :hidden].set(w1.astype(bf16))
    b1p = jnp.zeros((1, hid_p), f32).at[:, :hidden].set(b1f)
    w2p = jnp.zeros((hid_p, d_out), bf16).at[:hidden, :].set(w2.astype(bf16))
    return w1p, b1p, w2p, b2f


def _choose_tm(n: int, d_in: int, d_out: int, resident_bytes: int,
               block_m: int) -> int:
    """Batch tile that fits the per-generation VMEM budget."""
    budget = int(0.70 * _vmem_capacity_bytes())
    per_row = 2 * d_in * 4 + 2 * d_out * 4     # double-buffered f32 x + y tiles
    avail = budget - resident_bytes
    if avail < per_row * 8:
        # TODO(synk): weights alone blow the VMEM budget -> add a hidden-dim
        # grid axis ("arbitrary") with an f32 accumulator scratch; not needed
        # for the shapes exercised here.
        avail = per_row * 8
    tm = min(block_m, (avail // per_row) // 8 * 8, _round_up(n, 8))
    if n > 512 and tm >= 256:
        # >=2 grid steps so the 'parallel' axis shards across both v7x TCs,
        # and 256-row tiles fill whole MXU passes.
        tm = min(tm, _round_up((n + 1) // 2, 256)) // 256 * 256
    return max(_round_up(tm, 8), 8)


def neural_net_forward(x, w1_bf16, b1_f32, w2_bf16, b2_f32, *, block_m: int = 1024):
    """x: (N, D_in) f32; weights already converted by prepare_params()."""
    n, d_in = x.shape
    hid_p = w1_bf16.shape[1]
    d_out = w2_bf16.shape[1]

    # Worst-case resident weight VMEM (budgeted at 2 buffers even though we
    # request single buffering below).
    resident = 2 * (w1_bf16.size * 2 + w2_bf16.size * 2
                    + b1_f32.size * 4 + b2_f32.size * 4)
    tm = _choose_tm(n, d_in, d_out, resident, block_m)
    n_p = _round_up(n, tm)

    # Batch padding only when the tile does not divide N.  Feature dims are
    # never padded: full-extent blocks are legal for d_in / hidden / d_out.
    x_in = x if n_p == n else jnp.zeros((n_p, d_in), x.dtype).at[:n].set(x)

    grid = (n_p // tm,)

    need = resident + 2 * tm * d_in * 4 + 2 * tm * d_out * 4 + (2 << 20)
    vmem_limit = min(int(0.75 * _vmem_capacity_bytes()),
                     max(need, 32 * 1024 * 1024))

    cost = pl.CostEstimate(
        flops=2 * n_p * (d_in * hid_p + hid_p * d_out),
        transcendentals=0,
        bytes_accessed=(n_p * d_in * 4 + w1_bf16.size * 2 + w2_bf16.size * 2
                        + b1_f32.size * 4 + b2_f32.size * 4 + n_p * d_out * 4),
    )

    def run(weight_mode):
        def resident_spec(shape):
            if weight_mode is None:
                return pl.BlockSpec(shape, lambda i: (0, 0))
            return pl.BlockSpec(shape, lambda i: (0, 0), pipeline_mode=weight_mode)

        return pl.pallas_call(
            mlp_kernel,
            out_shape=jax.ShapeDtypeStruct((n_p, d_out), jnp.float32),
            grid=grid,
            in_specs=[
                pl.BlockSpec((tm, d_in), lambda i: (i, 0)),   # x: walks batch
                resident_spec((d_in, hid_p)),                 # W1: resident
                resident_spec((1, hid_p)),                    # b1: resident
                resident_spec((hid_p, d_out)),                # W2: resident
                resident_spec((1, d_out)),                    # b2: resident
            ],
            out_specs=pl.BlockSpec((tm, d_out), lambda i: (i, 0)),
            compiler_params=pltpu.CompilerParams(
                dimension_semantics=("parallel",),
                vmem_limit_bytes=vmem_limit,
            ),
            cost_estimate=cost,
        )(x_in, w1_bf16, b1_f32, w2_bf16, b2_f32)

    try:
        # Constant-index weights: single-buffer them to halve resident VMEM.
        y_p = run(pl.Buffered(1))
    except Exception:
        # Fallback if this jax build rejects Buffered(1) at lowering time.
        y_p = run(None)

    return y_p if n_p == n else y_p[:n]


def init_params(key, input_size, hidden_size, output_size):
    """Deterministic Kaiming-uniform-ish init (mimics nn.Linear defaults)."""
    k1, k2, k3, k4 = jax.random.split(key, 4)
    lim1 = 1.0 / jnp.sqrt(input_size)
    lim2 = 1.0 / jnp.sqrt(hidden_size)
    w1 = jax.random.uniform(k1, (input_size, hidden_size), jnp.float32, -lim1, lim1)
    b1 = jax.random.uniform(k2, (1, hidden_size), jnp.float32, -lim1, lim1)
    w2 = jax.random.uniform(k3, (hidden_size, output_size), jnp.float32, -lim2, lim2)
    b2 = jax.random.uniform(k4, (1, output_size), jnp.float32, -lim2, lim2)
    return w1, b1, w2, b2


if __name__ == "__main__":
    # Small shapes consistent with the module's forward signature:
    # x: (N, input_size) -> y: (N, output_size)
    N, INPUT_SIZE, HIDDEN, OUTPUT_SIZE = 8, 32, 32, 8

    key = jax.random.PRNGKey(0)
    kx, kp = jax.random.split(key)
    x = jax.random.normal(kx, (N, INPUT_SIZE), jnp.float32)
    w1, b1, w2, b2 = init_params(kp, INPUT_SIZE, HIDDEN, OUTPUT_SIZE)

    # One-time weight prep, hoisted out of the forward path.
    params = prepare_params(w1, b1, w2, b2)

    y = neural_net_forward(x, *params)
    y = jax.block_until_ready(y)
    assert y.shape == (N, OUTPUT_SIZE)

    # Pure-JAX reference mirroring the kernel's bf16-storage / f32-acc numerics.
    bf = lambda a: a.astype(jnp.bfloat16).astype(jnp.float32)
    h_ref = jnp.maximum(bf(x) @ bf(w1) + b1.reshape(1, -1), 0.0)
    y_ref = bf(h_ref) @ bf(w2) + b2.reshape(1, -1)
    assert jnp.allclose(y, y_ref, atol=1e-2, rtol=1e-2), "mismatch vs reference"

    print("KERNEL_OK")
</pallas_src>

<mosaic_0001>
module attributes {stable_mosaic.version = 11 : i64} {
  func.func @mlp_kernel(%arg0: i32, %arg1: memref<8x32xf32, #tpu.memory_space<vmem>>, %arg2: memref<32x128xbf16, #tpu.memory_space<vmem>>, %arg3: memref<1x128xf32, #tpu.memory_space<vmem>>, %arg4: memref<128x8xbf16, #tpu.memory_space<vmem>>, %arg5: memref<1x8xf32, #tpu.memory_space<vmem>>, %arg6: memref<8x8xf32, #tpu.memory_space<vmem>>) attributes {dimension_semantics = [#tpu.dimension_semantics<parallel>], iteration_bounds = array<i64: 1>, scalar_prefetch = 0 : i64, scratch_operands = 0 : i64, tpu.core_type = #tpu.core_type<tc>, window_params = [{transform_indices = @transform_0, window_bounds = array<i64: 8, 32>}, {pipeline_mode = #tpu.pipeline_mode<synchronous>, transform_indices = @transform_1, window_bounds = array<i64: 32, 128>}, {pipeline_mode = #tpu.pipeline_mode<synchronous>, transform_indices = @transform_2, window_bounds = array<i64: 1, 128>}, {pipeline_mode = #tpu.pipeline_mode<synchronous>, transform_indices = @transform_3, window_bounds = array<i64: 128, 8>}, {pipeline_mode = #tpu.pipeline_mode<synchronous>, transform_indices = @transform_4, window_bounds = array<i64: 1, 8>}, {transform_indices = @transform_5, window_bounds = array<i64: 8, 8>}]} {
    %c0 = arith.constant 0 : index
    %c0_0 = arith.constant 0 : index
    %0 = vector.load %arg1[%c0, %c0_0] : memref<8x32xf32, #tpu.memory_space<vmem>>, vector<8x32xf32>
    %1 = arith.truncf %0 : vector<8x32xf32> to vector<8x32xbf16>
    %c0_1 = arith.constant 0 : index
    %c0_2 = arith.constant 0 : index
    %2 = vector.load %arg2[%c0_1, %c0_2] : memref<32x128xbf16, #tpu.memory_space<vmem>>, vector<32x128xbf16>
    %cst = arith.constant dense<0.000000e+00> : vector<8x128xf32>
    %3 = tpu.matmul %1, %2, %cst {dimension_numbers = #tpu.dot_dimension_numbers<[1], [0], [0], [1], [0, 0, 1, 1], [], []>} : vector<8x32xbf16>, vector<32x128xbf16>, vector<8x128xf32> -> vector<8x128xf32>
    %c0_3 = arith.constant 0 : index
    %c0_4 = arith.constant 0 : index
    %4 = vector.load %arg3[%c0_3, %c0_4] : memref<1x128xf32, #tpu.memory_space<vmem>>, vector<1x128xf32>
    %5 = vector.broadcast %4 : vector<1x128xf32> to vector<8x128xf32>
    %6 = arith.addf %3, %5 : vector<8x128xf32>
    %cst_5 = arith.constant 0.000000e+00 : f32
    %7 = vector.broadcast %cst_5 : f32 to vector<8x128xf32>
    %8 = arith.maximumf %6, %7 : vector<8x128xf32>
    %9 = arith.truncf %8 : vector<8x128xf32> to vector<8x128xbf16>
    %c0_6 = arith.constant 0 : index
    %c0_7 = arith.constant 0 : index
    %10 = vector.load %arg4[%c0_6, %c0_7] : memref<128x8xbf16, #tpu.memory_space<vmem>>, vector<128x8xbf16>
    %cst_8 = arith.constant dense<0.000000e+00> : vector<8x8xf32>
    %11 = tpu.matmul %9, %10, %cst_8 {dimension_numbers = #tpu.dot_dimension_numbers<[1], [0], [0], [1], [0, 0, 1, 1], [], []>} : vector<8x128xbf16>, vector<128x8xbf16>, vector<8x8xf32> -> vector<8x8xf32>
    %c0_9 = arith.constant 0 : index
    %c0_10 = arith.constant 0 : index
    %12 = vector.load %arg5[%c0_9, %c0_10] : memref<1x8xf32, #tpu.memory_space<vmem>>, vector<1x8xf32>
    %13 = vector.broadcast %12 : vector<1x8xf32> to vector<8x8xf32>
    %14 = arith.addf %11, %13 : vector<8x8xf32>
    %c0_11 = arith.constant 0 : index
    %c0_12 = arith.constant 0 : index
    %15 = vector.load %arg6[%c0_11, %c0_12] : memref<8x8xf32, #tpu.memory_space<vmem>>, vector<8x8xf32>
    tpu.vector_store %arg6[%c0_11, %c0_12], %14 {strides = array<i32>} : memref<8x8xf32, #tpu.memory_space<vmem>>, vector<8x8xf32>,
    return
  }
  func.func @transform_0(%arg0: i32) -> (i32, i32) {
    %c0_i32 = arith.constant 0 : i32
    %c0_i32_0 = arith.constant 0 : i32
    return %arg0, %c0_i32 : i32, i32
  }
  func.func @transform_1(%arg0: i32) -> (i32, i32) {
    %c0_i32 = arith.constant 0 : i32
    %c0_i32_0 = arith.constant 0 : i32
    %c0_i32_1 = arith.constant 0 : i32
    return %c0_i32, %c0_i32_0 : i32, i32
  }
  func.func @transform_2(%arg0: i32) -> (i32, i32) {
    %c0_i32 = arith.constant 0 : i32
    %c0_i32_0 = arith.constant 0 : i32
    %c0_i32_1 = arith.constant 0 : i32
    return %c0_i32, %c0_i32_0 : i32, i32
  }
  func.func @transform_3(%arg0: i32) -> (i32, i32) {
    %c0_i32 = arith.constant 0 : i32
    %c0_i32_0 = arith.constant 0 : i32
    %c0_i32_1 = arith.constant 0 : i32
    return %c0_i32, %c0_i32_0 : i32, i32
  }
  func.func @transform_4(%arg0: i32) -> (i32, i32) {
    %c0_i32 = arith.constant 0 : i32
    %c0_i32_0 = arith.constant 0 : i32
    %c0_i32_1 = arith.constant 0 : i32
    return %c0_i32, %c0_i32_0 : i32, i32
  }
  func.func @transform_5(%arg0: i32) -> (i32, i32) {
    %c0_i32 = arith.constant 0 : i32
    %c0_i32_0 = arith.constant 0 : i32
    return %arg0, %c0_i32 : i32, i32
  }
}

module attributes {stable_mosaic.version = 11 : i64} {
  func.func @mlp_kernel(%arg0: i32, %arg1: memref<8x32xf32, #tpu.memory_space<vmem>>, %arg2: memref<32x128xbf16, #tpu.memory_space<vmem>>, %arg3: memref<1x128xf32, #tpu.memory_space<vmem>>, %arg4: memref<128x8xbf16, #tpu.memory_space<vmem>>, %arg5: memref<1x8xf32, #tpu.memory_space<vmem>>, %arg6: memref<8x8xf32, #tpu.memory_space<vmem>>) attributes {dimension_semantics = [#tpu.dimension_semantics<parallel>], iteration_bounds = array<i64: 1>, scalar_prefetch = 0 : i64, scratch_operands = 0 : i64, tpu.core_type = #tpu.core_type<tc>, window_params = [{transform_indices = @transform_0, window_bounds = array<i64: 8, 32>}, {pipeline_mode = #tpu.pipeline_mode<synchronous>, transform_indices = @transform_1, window_bounds = array<i64: 32, 128>}, {pipeline_mode = #tpu.pipeline_mode<synchronous>, transform_indices = @transform_2, window_bounds = array<i64: 1, 128>}, {pipeline_mode = #tpu.pipeline_mode<synchronous>, transform_indices = @transform_3, window_bounds = array<i64: 128, 8>}, {pipeline_mode = #tpu.pipeline_mode<synchronous>, transform_indices = @transform_4, window_bounds = array<i64: 1, 8>}, {transform_indices = @transform_5, window_bounds = array<i64: 8, 8>}]} {
    %c0 = arith.constant 0 : index
    %c0_0 = arith.constant 0 : index
    %0 = vector.load %arg1[%c0, %c0_0] : memref<8x32xf32, #tpu.memory_space<vmem>>, vector<8x32xf32>
    %1 = arith.truncf %0 : vector<8x32xf32> to vector<8x32xbf16>
    %c0_1 = arith.constant 0 : index
    %c0_2 = arith.constant 0 : index
    %2 = vector.load %arg2[%c0_1, %c0_2] : memref<32x128xbf16, #tpu.memory_space<vmem>>, vector<32x128xbf16>
    %cst = arith.constant dense<0.000000e+00> : vector<8x128xf32>
    %3 = tpu.matmul %1, %2, %cst {dimension_numbers = #tpu.dot_dimension_numbers<[1], [0], [0], [1], [0, 0, 1, 1], [], []>} : vector<8x32xbf16>, vector<32x128xbf16>, vector<8x128xf32> -> vector<8x128xf32>
    %c0_3 = arith.constant 0 : index
    %c0_4 = arith.constant 0 : index
    %4 = vector.load %arg3[%c0_3, %c0_4] : memref<1x128xf32, #tpu.memory_space<vmem>>, vector<1x128xf32>
    %5 = vector.broadcast %4 : vector<1x128xf32> to vector<8x128xf32>
    %6 = arith.addf %3, %5 : vector<8x128xf32>
    %cst_5 = arith.constant 0.000000e+00 : f32
    %7 = vector.broadcast %cst_5 : f32 to vector<8x128xf32>
    %8 = arith.maximumf %6, %7 : vector<8x128xf32>
    %9 = arith.truncf %8 : vector<8x128xf32> to vector<8x128xbf16>
    %c0_6 = arith.constant 0 : index
    %c0_7 = arith.constant 0 : index
    %10 = vector.load %arg4[%c0_6, %c0_7] : memref<128x8xbf16, #tpu.memory_space<vmem>>, vector<128x8xbf16>
    %cst_8 = arith.constant dense<0.000000e+00> : vector<8x8xf32>
    %11 = tpu.matmul %9, %10, %cst_8 {dimension_numbers = #tpu.dot_dimension_numbers<[1], [0], [0], [1], [0, 0, 1, 1], [], []>} : vector<8x128xbf16>, vector<128x8xbf16>, vector<8x8xf32> -> vector<8x8xf32>
    %c0_9 = arith.constant 0 : index
    %c0_10 = arith.constant 0 : index
    %12 = vector.load %arg5[%c0_9, %c0_10] : memref<1x8xf32, #tpu.memory_space<vmem>>, vector<1x8xf32>
    %13 = vector.broadcast %12 : vector<1x8xf32> to vector<8x8xf32>
    %14 = arith.addf %11, %13 : vector<8x8xf32>
    %c0_11 = arith.constant 0 : index
    %c0_12 = arith.constant 0 : index
    %15 = vector.load %arg6[%c0_11, %c0_12] : memref<8x8xf32, #tpu.memory_space<vmem>>, vector<8x8xf32>
    tpu.vector_store %arg6[%c0_11, %c0_12], %14 {strides = array<i32>} : memref<8x8xf32, #tpu.memory_space<vmem>>, vector<8x8xf32>,
    return
  }
  func.func @transform_0(%arg0: i32) -> (i32, i32) {
    %c0_i32 = arith.constant 0 : i32
    %c0_i32_0 = arith.constant 0 : i32
    return %arg0, %c0_i32 : i32, i32
  }
  func.func @transform_1(%arg0: i32) -> (i32, i32) {
    %c0_i32 = arith.constant 0 : i32
    %c0_i32_0 = arith.constant 0 : i32
    %c0_i32_1 = arith.constant 0 : i32
    return %c0_i32, %c0_i32_0 : i32, i32
  }
  func.func @transform_2(%arg0: i32) -> (i32, i32) {
    %c0_i32 = arith.constant 0 : i32
    %c0_i32_0 = arith.constant 0 : i32
    %c0_i32_1 = arith.constant 0 : i32
    return %c0_i32, %c0_i32_0 : i32, i32
  }
  func.func @transform_3(%arg0: i32) -> (i32, i32) {
    %c0_i32 = arith.constant 0 : i32
    %c0_i32_0 = arith.constant 0 : i32
    %c0_i32_1 = arith.constant 0 : i32
    return %c0_i32, %c0_i32_0 : i32, i32
  }
  func.func @transform_4(%arg0: i32) -> (i32, i32) {
    %c0_i32 = arith.constant 0 : i32
    %c0_i32_0 = arith.constant 0 : i32
    %c0_i32_1 = arith.constant 0 : i32
    return %c0_i32, %c0_i32_0 : i32, i32
  }
  func.func @transform_5(%arg0: i32) -> (i32, i32) {
    %c0_i32 = arith.constant 0 : i32
    %c0_i32_0 = arith.constant 0 : i32
    return %arg0, %c0_i32 : i32, i32
  }
}

</mosaic_0001>

<bundles_post_ra>
// kernel: tpu_custom_call.1
= control target key start
LH: loop header
LB: loop body
LE: loop exit
PB: predicated region body
PF: predicated region fallthrough
CT: control target
= control target key end

     0   :  { %v310_v1 = vmov 0.0   ;;  %vm311_vm0 = vmmov 0   ;;  %vm47_vm1 = vcmask 261120   ;;  %s394_s0 = inlined_call_operand.vmem [shape: f32[8,32], index: 0, kind: input, shape index: {}]   ;;  %s395_s1 = inlined_call_operand.vmem [shape: bf16[32,128], index: 1, kind: input, shape index: {}]   ;;  %s396_s2 = inlined_call_operand.vmem [shape: f32[1,128], index: 2, kind: input, shape index: {}]   ;;  %s397_s3 = inlined_call_operand.vmem [shape: bf16[128,8], index: 3, kind: input, shape index: {}]   ;;  %s398_s4 = inlined_call_operand.vmem [shape: f32[1,8], index: 4, kind: input, shape index: {}]   ;;  %s399_s5 = inlined_call_operand.hbm [shape: f32[8,8], index: 5, kind: output, shape index: {}]  }
   0x1   :  { %v276_v0 = vld [vmem:[%s395_s1] sm:$0xff]   ;;  %245 = vmatprep.subr.bf16.mxu0 %v310_v1  ;;  %v277_v2 = vld [vmem:[%s395_s1 + $0x8] sm:$0xff]   ;;  %253 = vmatprep.subr.bf16.mxu1 %v310_v1  ;;  %v280_v7 = vld [vmem:[%s397_s3 + $0x10] sm:$0xff]  }
   0x2   :  { %246 = vmatpush3.bf16.msra.mxu0 %v276_v0  ;;  %249 = vmatprep.mubr.msk.bf16.mxu0 %vm311_vm0, %v310_v1  ;;  %v22_v3 = vld [vmem:[%s394_s0] sm:$0xff]  ;;  %v279_v6 = vld [vmem:[%s397_s3 + $0x8] sm:$0xff]  }
   0x3   :  { %247 = vmatprep.subr.bf16.mxu0 %v310_v1  ;;  %v278_v4 = vld [vmem:[%s397_s3] sm:$0xff]   ;;  %269 = vmatprep.mubr.msk.bf16.mxu1 %vm311_vm0, %v310_v1  ;;  %v23_v5 = vpack.c.bf16 %v22_v3, %v22_v3 }
   0x4   :  { %254 = vmatpush3.bf16.msra.mxu1 %v278_v4 }
   0x5   :  { %255 = vmatprep.subr.bf16.mxu1 %v310_v1 }
   0x6   :  { %248 = vmatpush3.bf16.msra.mxu0 %v277_v2 }
   0x8   :  { %256 = vmatpush3.bf16.msra.mxu1 %v279_v6 }
   0x9   :  { %250 = vmatmul.mubr.msk.bf16.vlgmr.msra.gmra.mrb[0].mxu0 %vm47_vm1, %v23_v5  ;;  %257 = vmatprep.subr.bf16.mxu1 %v310_v1 }
   0xa   :  { %10 = vsyncpa [#allocation3], 0  ;;  %v281_v8 = vld [vmem:[%s397_s3 + $0x18] sm:$0xff]   ;;  %v282_v9 = vld [vmem:[%s397_s3 + $0x20] sm:$0xff]   ;;  %s312_s17 = smov [#allocation2]   ;;  %vm204_vm2 = vcmask 64512  }
   0xb   :  { %v283_v10 = vld [vmem:[%s397_s3 + $0x28] sm:$0xff]   ;;  %v284_v11 = vld [vmem:[%s397_s3 + $0x30] sm:$0xff]   ;;  %v285_v12 = vld [vmem:[%s397_s3 + $0x38] sm:$0xff]   ;;  %s212_s18 = sshll.u32 %s312_s17, 4  ;;  %s213_s18 = int_to_ptr.vmem [resolvable:$true] %s212_s18 }
   0xc   :  { %258 = vmatpush3.bf16.msra.mxu1 %v280_v7  ;;  %v220_v13 = vld [vmem:[%s396_s2] ss:$0 sm:$0xff]  ;;  %s286_s2 = scalar_lea.vmem %s213_s18, 128  ;;  %p291_p1 = scmp.lt.s32.totalorder %s213_s18, %s213_s18 }
   0xd   :  { %259 = vmatprep.subr.bf16.mxu1 %v310_v1  ;;  %v224_v21 = vld [vmem:[%s398_s4] ss:$0 sm:$0xff]  ;;  %p287_p0 = scmp.ne.s32.totalorder %s213_s18, %s286_s2  ;;  %p292_p2 = scmp.lt.s32.totalorder %s286_s2, %s286_s2 }
   0xf   :  { %p293_p3 = por %p292_p2, %p291_p1 }
  0x10   :  { %260 = vmatpush3.bf16.msra.mxu1 %v281_v8 }
  0x11   :  { %261 = vmatprep.subr.bf16.mxu1 %v310_v1  ;;  %p294_p4 = pnand %p293_p3, %p287_p0 }
  0x14   :  { %262 = vmatpush3.bf16.msra.mxu1 %v282_v9 }
  0x15   :  { %263 = vmatprep.subr.bf16.mxu1 %v310_v1 }
  0x18   :  { %264 = vmatpush3.bf16.msra.mxu1 %v283_v10 }
  0x19   :  { %265 = vmatprep.subr.bf16.mxu1 %v310_v1 }
  0x1c   :  { %266 = vmatpush3.bf16.msra.mxu1 %v284_v11 }
  0x1d   :  { %267 = vmatprep.subr.bf16.mxu1 %v310_v1 }
  0x20   :  { %268 = vmatpush3.bf16.msra.mxu1 %v285_v12 }
  0xdc   :  { %v85_v14 = vpop.f32.mrb[0].mxu0 }
  0xdd   :  { %v86_v15 = vadd.f32 %v220_v13, %v85_v14  ;;  %v251_v16 = vpop.f32.mrb[1].mxu0 }
  0xde   :  { %v88_v17 = vpop.f32.mrb[2].mxu0 }
  0xdf   :  { %v91_v18 = vmax.f32 %v86_v15, 0.0  ;;  %v252_v19 = vpop.f32.mrb[3].mxu0 }
  0xe1   :  { %v92_v20 = vpack.c.bf16 %v91_v18, %v91_v18 }
  0xe3   :  { %270 = vmatmul.mubr.bf16.vlgmr.msra.gmra.mrb[0].mxu1 %v92_v20 }
 0x1b6   :  { %v198_v22 = vpop.f32.mrb[0].mxu1 }
 0x1b7   :  { %v199_v23 = vadd.f32 %v224_v21, %v198_v22  ;;  %v271_v24 = vpop.f32.mrb[1].mxu1 }
 0x1b8   :  { %v201_v25 = vpop.f32.mrb[2].mxu1 }
 0x1b9   :  { %v272_v26 = vpop.f32.mrb[3].mxu1  ;;  %205 = vst.msk [vmem:[#allocation2] sm:$0xff] %vm204_vm2, %v199_v23 }
 0x1ba   :  { %297 = shalt.err (!%p294_p4)
}
 0x1bb   :  { %s298_s4 = scalar_lea.hbm %s399_s5, 128 }
 0x1bc   :  { %p299_p5 = scmp.ne.s32.totalorder %s399_s5, %s298_s4  ;;  %p302_p6 = scmp.lt.u32.totalorder %s298_s4, %s399_s5 }
 0x1be   :  { %p304_p7 = pnand %p302_p6, %p299_p5 }
 0x1c0   :  { %307 = shalt.err (!%p304_p7)
}
 0x1c1   :  { %215 = dma.vmem_to_hbm [thread:$0]  %s213_s18, 128, %s399_s5, [#allocation3]  }
 0x1c2   :  { %308 = dma.done.wait [#allocation3], 128  }
 0x1c3   :  { %309 = vsyncadd [#allocation3], 4294967168 }
 0x1c4   :  { %219 = vsyncpa [#allocation3], 1 }

// kernel: tpu_custom_call.1
= control target key start
LH: loop header
LB: loop body
LE: loop exit
PB: predicated region body
PF: predicated region fallthrough
CT: control target
= control target key end

     0   :  { %v310_v1 = vmov 0.0   ;;  %vm311_vm0 = vmmov 0   ;;  %vm47_vm1 = vcmask 261120   ;;  %s394_s0 = inlined_call_operand.vmem [shape: f32[8,32], index: 0, kind: input, shape index: {}]   ;;  %s395_s1 = inlined_call_operand.vmem [shape: bf16[32,128], index: 1, kind: input, shape index: {}]   ;;  %s396_s2 = inlined_call_operand.vmem [shape: f32[1,128], index: 2, kind: input, shape index: {}]   ;;  %s397_s3 = inlined_call_operand.vmem [shape: bf16[128,8], index: 3, kind: input, shape index: {}]   ;;  %s398_s4 = inlined_call_operand.vmem [shape: f32[1,8], index: 4, kind: input, shape index: {}]   ;;  %s399_s5 = inlined_call_operand.hbm [shape: f32[8,8], index: 5, kind: output, shape index: {}]  }
   0x1   :  { %v276_v0 = vld [vmem:[%s395_s1] sm:$0xff]   ;;  %245 = vmatprep.subr.bf16.mxu0 %v310_v1  ;;  %v277_v2 = vld [vmem:[%s395_s1 + $0x8] sm:$0xff]   ;;  %253 = vmatprep.subr.bf16.mxu1 %v310_v1  ;;  %v280_v7 = vld [vmem:[%s397_s3 + $0x10] sm:$0xff]  }
   0x2   :  { %246 = vmatpush3.bf16.msra.mxu0 %v276_v0  ;;  %249 = vmatprep.mubr.msk.bf16.mxu0 %vm311_vm0, %v310_v1  ;;  %v22_v3 = vld [vmem:[%s394_s0] sm:$0xff]  ;;  %v279_v6 = vld [vmem:[%s397_s3 + $0x8] sm:$0xff]  }
   0x3   :  { %247 = vmatprep.subr.bf16.mxu0 %v310_v1  ;;  %v278_v4 = vld [vmem:[%s397_s3] sm:$0xff]   ;;  %269 = vmatprep.mubr.msk.bf16.mxu1 %vm311_vm0, %v310_v1  ;;  %v23_v5 = vpack.c.bf16 %v22_v3, %v22_v3 }
   0x4   :  { %254 = vmatpush3.bf16.msra.mxu1 %v278_v4 }
   0x5   :  { %255 = vmatprep.subr.bf16.mxu1 %v310_v1 }
   0x6   :  { %248 = vmatpush3.bf16.msra.mxu0 %v277_v2 }
   0x8   :  { %256 = vmatpush3.bf16.msra.mxu1 %v279_v6 }
   0x9   :  { %250 = vmatmul.mubr.msk.bf16.vlgmr.msra.gmra.mrb[0].mxu0 %vm47_vm1, %v23_v5  ;;  %257 = vmatprep.subr.bf16.mxu1 %v310_v1 }
   0xa   :  { %10 = vsyncpa [#allocation3], 0  ;;  %v281_v8 = vld [vmem:[%s397_s3 + $0x18] sm:$0xff]   ;;  %v282_v9 = vld [vmem:[%s397_s3 + $0x20] sm:$0xff]   ;;  %s312_s17 = smov [#allocation2]   ;;  %vm204_vm2 = vcmask 64512  }
   0xb   :  { %v283_v10 = vld [vmem:[%s397_s3 + $0x28] sm:$0xff]   ;;  %v284_v11 = vld [vmem:[%s397_s3 + $0x30] sm:$0xff]   ;;  %v285_v12 = vld [vmem:[%s397_s3 + $0x38] sm:$0xff]   ;;  %s212_s18 = sshll.u32 %s312_s17, 4  ;;  %s213_s18 = int_to_ptr.vmem [resolvable:$true] %s212_s18 }
   0xc   :  { %258 = vmatpush3.bf16.msra.mxu1 %v280_v7  ;;  %v220_v13 = vld [vmem:[%s396_s2] ss:$0 sm:$0xff]  ;;  %s286_s2 = scalar_lea.vmem %s213_s18, 128  ;;  %p291_p1 = scmp.lt.s32.totalorder %s213_s18, %s213_s18 }
   0xd   :  { %259 = vmatprep.subr.bf16.mxu1 %v310_v1  ;;  %v224_v21 = vld [vmem:[%s398_s4] ss:$0 sm:$0xff]  ;;  %p287_p0 = scmp.ne.s32.totalorder %s213_s18, %s286_s2  ;;  %p292_p2 = scmp.lt.s32.totalorder %s286_s2, %s286_s2 }
   0xf   :  { %p293_p3 = por %p292_p2, %p291_p1 }
  0x10   :  { %260 = vmatpush3.bf16.msra.mxu1 %v281_v8 }
  0x11   :  { %261 = vmatprep.subr.bf16.mxu1 %v310_v1  ;;  %p294_p4 = pnand %p293_p3, %p287_p0 }
  0x14   :  { %262 = vmatpush3.bf16.msra.mxu1 %v282_v9 }
  0x15   :  { %263 = vmatprep.subr.bf16.mxu1 %v310_v1 }
  0x18   :  { %264 = vmatpush3.bf16.msra.mxu1 %v283_v10 }
  0x19   :  { %265 = vmatprep.subr.bf16.mxu1 %v310_v1 }
  0x1c   :  { %266 = vmatpush3.bf16.msra.mxu1 %v284_v11 }
  0x1d   :  { %267 = vmatprep.subr.bf16.mxu1 %v310_v1 }
  0x20   :  { %268 = vmatpush3.bf16.msra.mxu1 %v285_v12 }
  0xdc   :  { %v85_v14 = vpop.f32.mrb[0].mxu0 }
  0xdd   :  { %v86_v15 = vadd.f32 %v220_v13, %v85_v14  ;;  %v251_v16 = vpop.f32.mrb[1].mxu0 }
  0xde   :  { %v88_v17 = vpop.f32.mrb[2].mxu0 }
  0xdf   :  { %v91_v18 = vmax.f32 %v86_v15, 0.0  ;;  %v252_v19 = vpop.f32.mrb[3].mxu0 }
  0xe1   :  { %v92_v20 = vpack.c.bf16 %v91_v18, %v91_v18 }
  0xe3   :  { %270 = vmatmul.mubr.bf16.vlgmr.msra.gmra.mrb[0].mxu1 %v92_v20 }
 0x1b6   :  { %v198_v22 = vpop.f32.mrb[0].mxu1 }
 0x1b7   :  { %v199_v23 = vadd.f32 %v224_v21, %v198_v22  ;;  %v271_v24 = vpop.f32.mrb[1].mxu1 }
 0x1b8   :  { %v201_v25 = vpop.f32.mrb[2].mxu1 }
 0x1b9   :  { %v272_v26 = vpop.f32.mrb[3].mxu1  ;;  %205 = vst.msk [vmem:[#allocation2] sm:$0xff] %vm204_vm2, %v199_v23 }
 0x1ba   :  { %297 = shalt.err (!%p294_p4)
}
 0x1bb   :  { %s298_s4 = scalar_lea.hbm %s399_s5, 128 }
 0x1bc   :  { %p299_p5 = scmp.ne.s32.totalorder %s399_s5, %s298_s4  ;;  %p302_p6 = scmp.lt.u32.totalorder %s298_s4, %s399_s5 }
 0x1be   :  { %p304_p7 = pnand %p302_p6, %p299_p5 }
 0x1c0   :  { %307 = shalt.err (!%p304_p7)
}
 0x1c1   :  { %215 = dma.vmem_to_hbm [thread:$0]  %s213_s18, 128, %s399_s5, [#allocation3]  }
 0x1c2   :  { %308 = dma.done.wait [#allocation3], 128  }
 0x1c3   :  { %309 = vsyncadd [#allocation3], 4294967168 }
 0x1c4   :  { %219 = vsyncpa [#allocation3], 1 }

</bundles_post_ra>
